<compile_context>
chip_gen: v6e
topology: v6e:2x2x1
jax: 0.10.0
libtpu: 0.0.40
codegen_flags: <defaults>
</compile_context>

<pallas_src>
import numpy as np
import jax
import jax.numpy as jnp
from jax import lax
from jax.experimental import pallas as pl
from jax.experimental.pallas import tpu as pltpu

# RBF(n_kernels=5, mul_factor=2.0): multipliers = 2.0 ** (arange(5) - 2) = {.25,.5,1,2,4}
N_KERNELS = 5
MUL_FACTOR = 2.0
MULTIPLIERS = tuple(float(MUL_FACTOR ** (i - N_KERNELS // 2)) for i in range(N_KERNELS))


def _round_up(v, m):
    return ((v + m - 1) // m) * m


def _mmd_tile_kernel(rows_ref, cols_ref,                     # scalar prefetch (SMEM)
                     scale_ref,                              # SMEM (1,1) scalar
                     zr_ref, zc_ref, rn_ref, cn_ref, cr_ref, cc_ref,
                     o_ref):
    t = pl.program_id(0)

    @pl.when(t == 0)
    def _init():
        o_ref[...] = jnp.zeros_like(o_ref)

    # Gram block on the MXU; contract on the feature (lane) dim of both tiles,
    # so neither (T, D) slab needs a transpose.
    g = lax.dot_general(
        zr_ref[...], zc_ref[...],
        dimension_numbers=(((1,), (1,)), ((), ())),
        preferred_element_type=jnp.float32,
    )                                                         # (T, T)

    # Pairwise squared distances for this tile: ||zr||^2 + ||zc||^2 - 2 <zr, zc>.
    d2 = jnp.maximum(rn_ref[...] + cn_ref[...] - 2.0 * g, 0.0)

    # Multi-bandwidth RBF: sum_m exp(-d2 / (bw*m)), m in {4, 2, 1, 0.5, 0.25}
    #   = e + e^2 + e^4 + e^8 + e^16  with  e = exp(-d2 / (4*bw)).
    # One EUP exp + 4 VPU squarings instead of 5 exps.
    e1 = jnp.exp(d2 * scale_ref[0, 0])
    e2 = e1 * e1
    e4 = e2 * e2
    e8 = e4 * e4
    e16 = e8 * e8
    k = e1 + e2 + e4 + e8 + e16

    # Fused weighted reduction: this tile's contribution to c^T K c
    # (c_i = |w_i|/Nx for X rows, -1/Ny for Y rows, 0 for padding), so
    # c^T K c = XX - 2*XY + YY exactly as in the PyTorch module.
    # Restructured as (K @ cc) . cr: one mul per element + lane reduce.
    row = jnp.sum(k * cc_ref[...], axis=1, keepdims=True)     # (T, 1)
    partial = jnp.sum(row * cr_ref[...])

    # Only the upper triangle of the tile grid is visited: off-diagonal tiles
    # stand in for their mirror image as well (K and c c^T are symmetric).
    sym = jnp.where(rows_ref[t] == cols_ref[t],
                    jnp.float32(1.0), jnp.float32(2.0))
    o_ref[...] = o_ref[...] + jnp.full((1, 1), partial * sym, dtype=o_ref.dtype)


def mmd(x, y, weight=None, bandwidth=None, *, block=256):
    """Pallas MMD forward. x: (Nx, D); y: any shape reshaped to (-1, D)."""
    d = x.shape[1]
    y = y.reshape(-1, d)
    nx, ny = x.shape[0], y.shape[0]
    n = nx + ny

    z = jnp.concatenate([x, y], axis=0).astype(jnp.float32)       # (n, D)

    # Coefficient vector c so that c^T K c == XX - 2*XY + YY (means incl. weights).
    if weight is None:
        cx = jnp.full((nx,), 1.0 / nx, jnp.float32)
    else:
        cx = jnp.abs(weight).astype(jnp.float32).reshape(nx) / nx
    cy = jnp.full((ny,), -1.0 / ny, jnp.float32)
    c = jnp.concatenate([cx, cy])

    # Pad rows to a tile multiple; padded rows are all-zero with c = 0, so they
    # contribute nothing to either the bandwidth or the weighted kernel sum.
    tile = min(block, _round_up(n, 8))
    npad = _round_up(n, tile)
    z = jnp.pad(z, ((0, npad - n), (0, 0)))
    c = jnp.pad(c, (0, npad - n))

    # Analytic bandwidth (O(N*D)):  sum_ij ||z_i - z_j||^2
    #   = 2*n*sum_i ||z_i||^2 - 2*||sum_i z_i||^2   (exact, unclamped sum).
    norms = jnp.sum(z * z, axis=1)                                # (npad,)
    if bandwidth is None:
        colsum = jnp.sum(z, axis=0)
        total = 2.0 * n * jnp.sum(norms) - 2.0 * jnp.dot(colsum, colsum)
        bw = total / float(n * n - n)
    else:
        bw = jnp.asarray(bandwidth, jnp.float32)
    # Base term of the repeated-squaring trick: exp(-d2 / (4*bw)) = exp(d2 * scale).
    scale = (-1.0 / (4.0 * bw)).reshape(1, 1).astype(jnp.float32)

    rn = norms.reshape(npad, 1)
    cn = norms.reshape(1, npad)
    cr = c.reshape(npad, 1)
    cc = c.reshape(1, npad)

    # Upper-triangular tile enumeration (static), fed to the kernel via scalar
    # prefetch so the index_maps can gather the right row/col tiles.
    gdim = npad // tile
    ii, jj = np.triu_indices(gdim)
    rows = jnp.asarray(ii, dtype=jnp.int32)
    cols = jnp.asarray(jj, dtype=jnp.int32)
    num_tiles = int(rows.shape[0])

    out = pl.pallas_call(
        _mmd_tile_kernel,
        out_shape=jax.ShapeDtypeStruct((1, 1), jnp.float32),
        grid_spec=pltpu.PrefetchScalarGridSpec(
            num_scalar_prefetch=2,
            grid=(num_tiles,),
            in_specs=[
                pl.BlockSpec((1, 1), lambda t, rows, cols: (0, 0),
                             memory_space=pltpu.MemorySpace.SMEM),    # scale scalar
                pl.BlockSpec((tile, d), lambda t, rows, cols: (rows[t], 0)),  # Z row tile
                pl.BlockSpec((tile, d), lambda t, rows, cols: (cols[t], 0)),  # Z col tile
                pl.BlockSpec((tile, 1), lambda t, rows, cols: (rows[t], 0)),  # row norms
                pl.BlockSpec((1, tile), lambda t, rows, cols: (0, cols[t])),  # col norms
                pl.BlockSpec((tile, 1), lambda t, rows, cols: (rows[t], 0)),  # row coeffs
                pl.BlockSpec((1, tile), lambda t, rows, cols: (0, cols[t])),  # col coeffs
            ],
            out_specs=pl.BlockSpec((1, 1), lambda t, rows, cols: (0, 0)),     # resident acc
        ),
        compiler_params=pltpu.CompilerParams(
            dimension_semantics=("arbitrary",)),
    )(rows, cols, scale, z, z, rn, cn, cr, cc)
    return out[0, 0]


def mmd_ref(x, y, weight=None):
    """Pure-JAX reference mirroring the PyTorch forward."""
    y = y.reshape(-1, x.shape[1])
    z = jnp.vstack([x, y]).astype(jnp.float32)
    d2 = jnp.sum((z[:, None, :] - z[None, :, :]) ** 2, axis=-1)
    n = z.shape[0]
    bw = jnp.sum(d2) / (n * n - n)
    mults = jnp.asarray(MULTIPLIERS, jnp.float32)
    K = jnp.sum(jnp.exp(-d2[None, ...] / (bw * mults)[:, None, None]), axis=0)
    nx = x.shape[0]
    if weight is None:
        XX = K[:nx, :nx].mean()
        XY = K[:nx, nx:].mean()
        YY = K[nx:, nx:].mean()
    else:
        xw = jnp.abs(weight).astype(jnp.float32)
        XX = (K[:nx, :nx] * jnp.outer(xw, xw)).mean()
        XY = (K[:nx, nx:] * xw[:, None]).mean()
        YY = K[nx:, nx:].mean()
    return XX - 2.0 * XY + YY


if __name__ == "__main__":
    key = jax.random.PRNGKey(0)
    kx, ky, kw, k2x, k2y = jax.random.split(key, 5)

    # Small shapes consistent with the module: X (Nx=8, D=32); Y arbitrary shape
    # with trailing dims flattening to D (exercises the reshape(-1, D) glue).
    X = jax.random.normal(kx, (8, 32), dtype=jnp.float32)
    Y = jax.random.normal(ky, (4, 2, 32), dtype=jnp.float32)

    out = jax.block_until_ready(mmd(X, Y))
    ref = jax.block_until_ready(mmd_ref(X, Y))
    assert jnp.allclose(out, ref, rtol=1e-3, atol=1e-4), (out, ref)

    # Weighted path (weight on the X samples, as in the module).
    W = jax.random.normal(kw, (8,), dtype=jnp.float32)
    outw = jax.block_until_ready(mmd(X, Y, weight=W))
    refw = jax.block_until_ready(mmd_ref(X, Y, weight=W))
    assert jnp.allclose(outw, refw, rtol=1e-3, atol=1e-4), (outw, refw)

    # Moderate case that exercises the triangular tile grid
    # (n=320 -> padded 512, gdim=2 -> tiles (0,0),(0,1),(1,1)).
    X2 = jax.random.normal(k2x, (200, 32), dtype=jnp.float32)
    Y2 = jax.random.normal(k2y, (120, 32), dtype=jnp.float32) + 0.5
    out2 = jax.block_until_ready(mmd(X2, Y2))
    ref2 = jax.block_until_ready(mmd_ref(X2, Y2))
    assert jnp.allclose(out2, ref2, rtol=2e-3, atol=2e-4), (out2, ref2)

    print("KERNEL_OK")
</pallas_src>

<mosaic_0001>
module attributes {stable_mosaic.version = 11 : i64} {
  func.func @_mmd_tile_kernel(%arg0: i32, %arg1: memref<1xi32, #tpu.memory_space<smem>>, %arg2: memref<1xi32, #tpu.memory_space<smem>>, %arg3: memref<1x1xf32, #tpu.memory_space<smem>>, %arg4: memref<16x32xf32, #tpu.memory_space<vmem>>, %arg5: memref<16x32xf32, #tpu.memory_space<vmem>>, %arg6: memref<16x1xf32, #tpu.memory_space<vmem>>, %arg7: memref<1x16xf32, #tpu.memory_space<vmem>>, %arg8: memref<16x1xf32, #tpu.memory_space<vmem>>, %arg9: memref<1x16xf32, #tpu.memory_space<vmem>>, %arg10: memref<1x1xf32, #tpu.memory_space<vmem>>) attributes {dimension_semantics = [#tpu.dimension_semantics<arbitrary>], iteration_bounds = array<i64: 1>, scalar_prefetch = 2 : i64, scratch_operands = 0 : i64, tpu.core_type = #tpu.core_type<tc>, window_params = [{transform_indices = @transform_0, window_bounds = array<i64: 1, 1>}, {transform_indices = @transform_1, window_bounds = array<i64: 16, 32>}, {transform_indices = @transform_2, window_bounds = array<i64: 16, 32>}, {transform_indices = @transform_3, window_bounds = array<i64: 16, 1>}, {transform_indices = @transform_4, window_bounds = array<i64: 1, 16>}, {transform_indices = @transform_5, window_bounds = array<i64: 16, 1>}, {transform_indices = @transform_6, window_bounds = array<i64: 1, 16>}, {pipeline_mode = #tpu.pipeline_mode<synchronous>, transform_indices = @transform_7, window_bounds = array<i64: 1, 1>}]} {
    %c0_i32 = arith.constant 0 : i32
    %0 = arith.cmpi eq, %arg0, %c0_i32 : i32
    %1 = arith.extui %0 : i1 to i32
    %c0_i32_0 = arith.constant 0 : i32
    %2 = arith.cmpi ne, %1, %c0_i32_0 : i32
    scf.if %2 {
      %cst_24 = arith.constant 0.000000e+00 : f32
      %50 = vector.broadcast %cst_24 : f32 to vector<1x1xf32>
      %c0_25 = arith.constant 0 : index
      %c0_26 = arith.constant 0 : index
      %51 = vector.load %arg10[%c0_25, %c0_26] : memref<1x1xf32, #tpu.memory_space<vmem>>, vector<1x1xf32>
      tpu.vector_store %arg10[%c0_25, %c0_26], %50 {strides = array<i32>} : memref<1x1xf32, #tpu.memory_space<vmem>>, vector<1x1xf32>,
    } else {
    }
    %c0 = arith.constant 0 : index
    %c0_1 = arith.constant 0 : index
    %3 = vector.load %arg4[%c0, %c0_1] : memref<16x32xf32, #tpu.memory_space<vmem>>, vector<16x32xf32>
    %c0_2 = arith.constant 0 : index
    %c0_3 = arith.constant 0 : index
    %4 = vector.load %arg5[%c0_2, %c0_3] : memref<16x32xf32, #tpu.memory_space<vmem>>, vector<16x32xf32>
    %cst = arith.constant dense<0.000000e+00> : vector<16x16xf32>
    %5 = tpu.matmul %3, %4, %cst {dimension_numbers = #tpu.dot_dimension_numbers<[1], [1], [0], [0], [0, 0, 1, 0], [], []>} : vector<16x32xf32>, vector<16x32xf32>, vector<16x16xf32> -> vector<16x16xf32>
    %c0_4 = arith.constant 0 : index
    %c0_5 = arith.constant 0 : index
    %6 = vector.load %arg6[%c0_4, %c0_5] : memref<16x1xf32, #tpu.memory_space<vmem>>, vector<16x1xf32>
    %c0_6 = arith.constant 0 : index
    %c0_7 = arith.constant 0 : index
    %7 = vector.load %arg7[%c0_6, %c0_7] : memref<1x16xf32, #tpu.memory_space<vmem>>, vector<1x16xf32>
    %8 = vector.broadcast %6 : vector<16x1xf32> to vector<16x16xf32>
    %9 = vector.broadcast %7 : vector<1x16xf32> to vector<16x16xf32>
    %10 = arith.addf %8, %9 : vector<16x16xf32>
    %cst_8 = arith.constant 2.000000e+00 : f32
    %11 = vector.broadcast %cst_8 : f32 to vector<16x16xf32>
    %12 = arith.mulf %11, %5 : vector<16x16xf32>
    %13 = arith.subf %10, %12 : vector<16x16xf32>
    %cst_9 = arith.constant 0.000000e+00 : f32
    %14 = vector.broadcast %cst_9 : f32 to vector<16x16xf32>
    %15 = arith.maximumf %13, %14 : vector<16x16xf32>
    %c0_10 = arith.constant 0 : index
    %c0_11 = arith.constant 0 : index
    %16 = memref.load %arg3[%c0_10, %c0_11] : memref<1x1xf32, #tpu.memory_space<smem>>
    %17 = vector.broadcast %16 : f32 to vector<16x16xf32>
    %18 = arith.mulf %15, %17 : vector<16x16xf32>
    %19 = math.exp %18 : vector<16x16xf32>
    %20 = arith.mulf %19, %19 : vector<16x16xf32>
    %21 = arith.mulf %20, %20 : vector<16x16xf32>
    %22 = arith.mulf %21, %21 : vector<16x16xf32>
    %23 = arith.mulf %22, %22 : vector<16x16xf32>
    %24 = arith.addf %19, %20 : vector<16x16xf32>
    %25 = arith.addf %24, %21 : vector<16x16xf32>
    %26 = arith.addf %25, %22 : vector<16x16xf32>
    %27 = arith.addf %26, %23 : vector<16x16xf32>
    %c0_12 = arith.constant 0 : index
    %c0_13 = arith.constant 0 : index
    %28 = vector.load %arg9[%c0_12, %c0_13] : memref<1x16xf32, #tpu.memory_space<vmem>>, vector<1x16xf32>
    %29 = vector.broadcast %28 : vector<1x16xf32> to vector<16x16xf32>
    %30 = arith.mulf %27, %29 : vector<16x16xf32>
    %cst_14 = arith.constant dense<0.000000e+00> : vector<16xf32>
    %31 = vector.multi_reduction <add>, %30, %cst_14 [1] : vector<16x16xf32> to vector<16xf32>
    %32 = vector.shape_cast %31 : vector<16xf32> to vector<16x1xf32>
    %c0_15 = arith.constant 0 : index
    %c0_16 = arith.constant 0 : index
    %33 = vector.load %arg8[%c0_15, %c0_16] : memref<16x1xf32, #tpu.memory_space<vmem>>, vector<16x1xf32>
    %34 = arith.mulf %32, %33 : vector<16x1xf32>
    %35 = vector.shape_cast %34 : vector<16x1xf32> to vector<1x16x1xf32>
    %cst_17 = arith.constant dense<0.000000e+00> : vector<1xf32>
    %36 = vector.multi_reduction <add>, %35, %cst_17 [1, 2] : vector<1x16x1xf32> to vector<1xf32>
    %37 = vector.shape_cast %36 : vector<1xf32> to vector<1x1x1xf32>
    %38 = vector.extract %37[0, 0, 0] : f32 from vector<1x1x1xf32>
    %39 = arith.index_cast %arg0 : i32 to index
    %40 = memref.load %arg1[%39] : memref<1xi32, #tpu.memory_space<smem>>
    %41 = arith.index_cast %arg0 : i32 to index
    %42 = memref.load %arg2[%41] : memref<1xi32, #tpu.memory_space<smem>>
    %43 = arith.cmpi eq, %40, %42 : i32
    %cst_18 = arith.constant 1.000000e+00 : f32
    %cst_19 = arith.constant 2.000000e+00 : f32
    %44 = arith.select %43, %cst_18, %cst_19 : f32
    %c0_20 = arith.constant 0 : index
    %c0_21 = arith.constant 0 : index
    %45 = vector.load %arg10[%c0_20, %c0_21] : memref<1x1xf32, #tpu.memory_space<vmem>>, vector<1x1xf32>
    %46 = arith.mulf %38, %44 : f32
    %47 = vector.broadcast %46 : f32 to vector<1x1xf32>
    %48 = arith.addf %45, %47 : vector<1x1xf32>
    %c0_22 = arith.constant 0 : index
    %c0_23 = arith.constant 0 : index
    %49 = vector.load %arg10[%c0_22, %c0_23] : memref<1x1xf32, #tpu.memory_space<vmem>>, vector<1x1xf32>
    tpu.vector_store %arg10[%c0_22, %c0_23], %48 {strides = array<i32>} : memref<1x1xf32, #tpu.memory_space<vmem>>, vector<1x1xf32>,
    return
  }
  func.func @transform_0(%arg0: i32, %arg1: memref<1xi32, #tpu.memory_space<smem>>, %arg2: memref<1xi32, #tpu.memory_space<smem>>) -> (i32, i32) {
    %c0_i32 = arith.constant 0 : i32
    %c0_i32_0 = arith.constant 0 : i32
    %c0_i32_1 = arith.constant 0 : i32
    return %c0_i32, %c0_i32_0 : i32, i32
  }
  func.func @transform_1(%arg0: i32, %arg1: memref<1xi32, #tpu.memory_space<smem>>, %arg2: memref<1xi32, #tpu.memory_space<smem>>) -> (i32, i32) {
    %0 = arith.index_cast %arg0 : i32 to index
    %1 = memref.load %arg1[%0] : memref<1xi32, #tpu.memory_space<smem>>
    %c0_i32 = arith.constant 0 : i32
    %c0_i32_0 = arith.constant 0 : i32
    return %1, %c0_i32 : i32, i32
  }
  func.func @transform_2(%arg0: i32, %arg1: memref<1xi32, #tpu.memory_space<smem>>, %arg2: memref<1xi32, #tpu.memory_space<smem>>) -> (i32, i32) {
    %0 = arith.index_cast %arg0 : i32 to index
    %1 = memref.load %arg2[%0] : memref<1xi32, #tpu.memory_space<smem>>
    %c0_i32 = arith.constant 0 : i32
    %c0_i32_0 = arith.constant 0 : i32
    return %1, %c0_i32 : i32, i32
  }
  func.func @transform_3(%arg0: i32, %arg1: memref<1xi32, #tpu.memory_space<smem>>, %arg2: memref<1xi32, #tpu.memory_space<smem>>) -> (i32, i32) {
    %0 = arith.index_cast %arg0 : i32 to index
    %1 = memref.load %arg1[%0] : memref<1xi32, #tpu.memory_space<smem>>
    %c0_i32 = arith.constant 0 : i32
    %c0_i32_0 = arith.constant 0 : i32
    return %1, %c0_i32 : i32, i32
  }
  func.func @transform_4(%arg0: i32, %arg1: memref<1xi32, #tpu.memory_space<smem>>, %arg2: memref<1xi32, #tpu.memory_space<smem>>) -> (i32, i32) {
    %0 = arith.index_cast %arg0 : i32 to index
    %1 = memref.load %arg2[%0] : memref<1xi32, #tpu.memory_space<smem>>
    %c0_i32 = arith.constant 0 : i32
    %c0_i32_0 = arith.constant 0 : i32
    return %c0_i32, %1 : i32, i32
  }
  func.func @transform_5(%arg0: i32, %arg1: memref<1xi32, #tpu.memory_space<smem>>, %arg2: memref<1xi32, #tpu.memory_space<smem>>) -> (i32, i32) {
    %0 = arith.index_cast %arg0 : i32 to index
    %1 = memref.load %arg1[%0] : memref<1xi32, #tpu.memory_space<smem>>
    %c0_i32 = arith.constant 0 : i32
    %c0_i32_0 = arith.constant 0 : i32
    return %1, %c0_i32 : i32, i32
  }
  func.func @transform_6(%arg0: i32, %arg1: memref<1xi32, #tpu.memory_space<smem>>, %arg2: memref<1xi32, #tpu.memory_space<smem>>) -> (i32, i32) {
    %0 = arith.index_cast %arg0 : i32 to index
    %1 = memref.load %arg2[%0] : memref<1xi32, #tpu.memory_space<smem>>
    %c0_i32 = arith.constant 0 : i32
    %c0_i32_0 = arith.constant 0 : i32
    return %c0_i32, %1 : i32, i32
  }
  func.func @transform_7(%arg0: i32, %arg1: memref<1xi32, #tpu.memory_space<smem>>, %arg2: memref<1xi32, #tpu.memory_space<smem>>) -> (i32, i32) {
    %c0_i32 = arith.constant 0 : i32
    %c0_i32_0 = arith.constant 0 : i32
    %c0_i32_1 = arith.constant 0 : i32
    return %c0_i32, %c0_i32_0 : i32, i32
  }
}

</mosaic_0001>

<bundles_post_ra>
// kernel: tpu_custom_call.1
= control target key start
LH: loop header
LB: loop body
LE: loop exit
PB: predicated region body
PF: predicated region fallthrough
CT: control target
= control target key end

     0   :  { %s553_s0 = inlined_call_operand.<no memory space> [shape: s32[1], index: 0, kind: input, shape index: {}]   ;;  %s554_s1 = inlined_call_operand.<no memory space> [shape: s32[1], index: 1, kind: input, shape index: {}]   ;;  %s555_s2 = inlined_call_operand.<no memory space> [shape: f32[1,1], index: 2, kind: input, shape index: {}]   ;;  %s556_s3 = inlined_call_operand.vmem [shape: f32[16,32], index: 3, kind: input, shape index: {}]   ;;  %s557_s4 = inlined_call_operand.vmem [shape: f32[16,32], index: 4, kind: input, shape index: {}]   ;;  %s558_s5 = inlined_call_operand.vmem [shape: f32[16,1], index: 5, kind: input, shape index: {}]   ;;  %s559_s6 = inlined_call_operand.vmem [shape: f32[1,16], index: 6, kind: input, shape index: {}]   ;;  %s560_s7 = inlined_call_operand.vmem [shape: f32[16,1], index: 7, kind: input, shape index: {}]   ;;  %s561_s8 = inlined_call_operand.vmem [shape: f32[1,16], index: 8, kind: input, shape index: {}]   ;;  %s562_s9 = inlined_call_operand.hbm [shape: f32[1,1], index: 9, kind: output, shape index: {}]  }
   0x1   :  { %s386_s11 = sshll.u32 %s554_s1, 1  ;;  %s384_s14 = sshll.u32 %s553_s0, 1 }
   0x2   :  { %17 = vsyncpa [#allocation7], 0  ;;  %p116_p0 = scmp.lt.s32.totalorder %s386_s11, 1  ;;  %p108_p1 = scmp.lt.s32.totalorder %s384_s14, 1  ;;  %v441_v0 = vmov 0   ;;  %vm158_vm0 = vcmask 261120   ;;  %v274_v17 = vstv %s555_s2 }
   0x3   :  { %414 = vset.pattern.permute.xlu0 %v441_v0  ;;  %p131_p2 = scmp.lt.s32.totalorder %s554_s1, 0  ;;  %vm306_vm1 = vcmask 130048   ;;  %vm317_vm2 = vcmask 7168   ;;  %vm152_vm3 = vcmask 0   ;;  %v442_v57 = vmov 0.0   ;;  %p332_p3 = scmp.eq.s32.totalorder %s553_s0, %s554_s1 }
   0x4   :  { %s564_s11 = smov (!%p116_p0, %s386_s11), 1  ;;  %s566_s14 = smov (!%p108_p1, %s384_s14), 1  ;;  %153 = vst.msk [vmem:[#allocation6] sm:$0x1] %vm152_vm3, %v442_v57 }
   0x5   :  { %s387_s15 = sshll.u32 %s564_s11, 3  ;;  %s503_s19 = sshll.u32 %s566_s14, 3 }
   0x6   :  { %s119_s18 = scalar_lea.vmem %s557_s4, %s387_s15  ;;  %s111_s22 = scalar_lea.vmem %s556_s3, %s503_s19 }
   0x7   :  { %v156_v1 = vld [vmem:[%s119_s18] sm:$0xff]  ;;  %v157_v2 = vld [vmem:[%s119_s18 + $0x8] sm:$0xff]  ;;  %s127_s25 = scalar_lea.vmem %s558_s5, %s503_s19  ;;  %s140_s15 = scalar_lea.vmem %s560_s7, %s503_s19 }
   0x8   :  { %402 = vmatprep.subr.msk.mxu0 %vm158_vm0, %v157_v2  ;;  %v154_v3 = vld [vmem:[%s111_s22] sm:$0xff]  ;;  %v247_v5 = vld [vmem:[%s127_s25 + $0x8] sm:$0xff]  ;;  %s525_s27 = scalar_select %p131_p2, %s554_s1, 0 }
   0x9   :  { %v246_v4 = vld [vmem:[%s127_s25] sm:$0xff]  ;;  %403 = vmatpush3.xpose.msk.msra.mxu0 %vm158_vm0, %v157_v2  ;;  %406 = vmatprep.mubr.msk.f32.mxu0 %vm158_vm0, %v154_v3  ;;  %v155_v6 = vld [vmem:[%s111_s22 + $0x8] sm:$0xff]  ;;  %s333_s18 = scalar_select %p332_p3, 1.0, 2.0 }
   0xa   :  { %404 = vmatprep.subr.msk.mxu0 %vm158_vm0, %v156_v1  ;;  %251 = vperm.xlu0 %414, %v246_v4   ;;  %s133_s30 = scalar_lea.vmem %s559_s6, %s525_s27  ;;  %s146_s12 = scalar_lea.vmem %s561_s8, %s525_s27  ;;  %v313_v48 = vld [vmem:[%s140_s15] sm:$0xff]  ;;  %v314_v50 = vld [vmem:[%s140_s15 + $0x8] sm:$0xff] }
   0xb   :  { %v396_v8 = vld [vmem:[%s133_s30] ss:$0 sm:$0xff]  ;;  %s443_s21 = smov [#allocation6]  }
   0xc   :  { %v397_v43 = vld [vmem:[%s146_s12] ss:$0 sm:$0xff]  ;;  %s346_s22 = sshll.u32 %s443_s21, 4  ;;  %s347_s22 = int_to_ptr.vmem [resolvable:$true] %s346_s22 }
   0xd   :  { %405 = vmatpush3.xpose.msk.msra.mxu0 %vm158_vm0, %v156_v1  ;;  %v334_v1 = vld [vmem:[#allocation6] sm:$0x1]  ;;  %s419_s23 = scalar_lea.vmem %s347_s22, 16  ;;  %s423_s24 = scalar_lea.vmem %s347_s22, 32 }
   0xe   :  { %256 = vperm.xlu0 %414, %v247_v5   ;;  %p420_p4 = scmp.ne.s32.totalorder %s347_s22, %s419_s23  ;;  %p424_p5 = scmp.lt.s32.totalorder %s347_s22, %s347_s22 }
   0xf   :  { %p425_p6 = scmp.lt.s32.totalorder %s423_s24, %s419_s23 }
  0x10   :  { %407 = vmatmul.mubr.msk.f32.vlgmr.msra.gmra.mxu0 %vm158_vm0, %v155_v6 }
  0x11   :  { %p426_p7 = por %p425_p6, %p424_p5 }
  0x13   :  { %p427_p8 = pnand %p426_p7, %p420_p4 }
  0x85   :  { %v252_v7 = vpop.permute.xlu0 %251 }
  0x86   :  { %v265_v12 = vadd.f32 %v396_v8, %v252_v7 }
  0x89   :  { %v257_v9 = vpop.permute.xlu0 %256 }
  0x8a   :  { %v266_v10 = vadd.f32 %v396_v8, %v257_v9 }
  0xd0   :  { %v408_v11 = vpop.f32.mrf.mxu0 }
  0xd1   :  { %v268_v13 = vmul.f32 2.0, %v408_v11 }
  0xd2   :  { %v237_v14 = vpop.f32.mrf.mxu0 }
  0xd3   :  { %v270_v15 = vsub.f32 %v266_v10, %v268_v13  ;;  %v267_v16 = vmul.f32 2.0, %v237_v14 }
  0xd5   :  { %v272_v18 = vmax.f32 %v270_v15, 0.0  ;;  %v269_v19 = vsub.f32 %v265_v12, %v267_v16 }
  0xd7   :  { %v276_v20 = vmul.f32 %v274_v17, %v272_v18  ;;  %v271_v21 = vmax.f32 %v269_v19, 0.0 }
  0xd9   :  { %v279_v22 = vmul.f32 1.442695, %v276_v20  ;;  %v275_v23 = vmul.f32 %v274_v17, %v271_v21 }
  0xdb   :  { %415 = vpow2.f32 %v279_v22  ;;  %v277_v24 = vmul.f32 1.442695, %v275_v23 }
  0xdd   :  { %417 = vpow2.f32 %v277_v24 }
  0xe8   :  { %v416_v25 = vpop.eup %415 }
  0xe9   :  { %v282_v26 = vmul.f32 %v416_v25, %v416_v25 }
  0xea   :  { %v418_v27 = vpop.eup %417 }
  0xeb   :  { %v281_v28 = vmul.f32 %v418_v27, %v418_v27  ;;  %v284_v29 = vmul.f32 %v282_v26, %v282_v26  ;;  %v290_v30 = vadd.f32 %v416_v25, %v282_v26 }
  0xed   :  { %v283_v31 = vmul.f32 %v281_v28, %v281_v28  ;;  %v289_v32 = vadd.f32 %v418_v27, %v281_v28  ;;  %v286_v33 = vmul.f32 %v284_v29, %v284_v29  ;;  %v292_v34 = vadd.f32 %v290_v30, %v284_v29 }
  0xef   :  { %v285_v35 = vmul.f32 %v283_v31, %v283_v31  ;;  %v291_v36 = vadd.f32 %v289_v32, %v283_v31  ;;  %v288_v37 = vmul.f32 %v286_v33, %v286_v33  ;;  %v294_v38 = vadd.f32 %v292_v34, %v286_v33 }
  0xf1   :  { %v287_v39 = vmul.f32 %v285_v35, %v285_v35  ;;  %v293_v40 = vadd.f32 %v291_v36, %v285_v35  ;;  %v296_v42 = vadd.f32 %v294_v38, %v288_v37 }
  0xf3   :  { %v295_v41 = vadd.f32 %v293_v40, %v287_v39  ;;  %v305_v46 = vmul.f32 %v397_v43, %v296_v42 }
  0xf5   :  { %v304_v44 = vmul.f32 %v397_v43, %v295_v41  ;;  %v310_v47 = vsel %vm306_vm1, %v305_v46, 0.0 }
  0xf7   :  { %v307_v45 = vsel %vm306_vm1, %v304_v44, 0.0 }
  0xf8   :  { %308 = vadd.xlane.f32.xlu1 %v307_v45 }
  0xfc   :  { %311 = vadd.xlane.f32.xlu1 %v310_v47 }
 0x181   :  { %v309_v49 = vpop.xlane.xlu1 %308 }
 0x182   :  { %v315_v51 = vmul.f32 %v313_v48, %v309_v49 }
 0x184   :  { %v318_v54 = vsel %vm317_vm2, %v315_v51, 0.0 }
 0x185   :  { %v312_v52 = vpop.xlane.xlu1 %311 }
 0x186   :  { %v316_v53 = vmul.f32 %v314_v50, %v312_v52 }
 0x188   :  { %v319_v55 = vsel %vm317_vm2, %v316_v53, 0.0 }
 0x189   :  { %v320_v56 = vadd.f32 %v319_v55, %v318_v54 }
 0x18b   :  { %321 = vadd.xlane.f32.xlu0 %v320_v56 }
 0x214   :  { %v322_v58 = vpop.xlane.xlu0 %321 }
 0x215   :  { %v323_v59 = vrot.slane %v322_v58, 4 }
 0x217   :  { %v324_v60 = vadd.f32 %v323_v59, %v322_v58 }
 0x219   :  { %v325_v61 = vrot.slane %v324_v60, 2 }
 0x21b   :  { %v326_v62 = vadd.f32 %v325_v61, %v324_v60 }
 0x21d   :  { %v327_v63 = vrot.slane %v326_v62, 1 }
 0x21f   :  { %v328_v0 = vadd.f32 %v327_v63, %v326_v62 }
 0x221   :  { %409 = vpush %v328_v0 }
 0x252   :  { %s410_s19 = spop %409 }
 0x253   :  { %s335_s20 = smul.f32 %s410_s19, %s333_s18 }
 0x255   :  { %v336_v2 = vstv %s335_s20 }
 0x256   :  { %v337_v3 = vadd.f32 %v336_v2, %v334_v1 }
 0x258   :  { %339 = vst.msk [vmem:[#allocation6] sm:$0x1] %vm152_vm3, %v337_v3 }
 0x259   :  { %430 = shalt.err (!%p427_p8)
}
 0x25a   :  { %349 = dma.vmem_to_hbm [thread:$0]  %s347_s22, 16, %s562_s9, [#allocation7]  }
 0x25b   :  { %439 = dma.done.wait [#allocation7], 16  }
 0x25c   :  { %440 = vsyncadd [#allocation7], 4294967280 }
 0x25d   :  { %353 = vsyncpa [#allocation7], 1 }

</bundles_post_ra>
